<compile_context>
chip_gen: v7x
topology: tpu7x:2x2x1
jax: 0.10.0
libtpu: 0.0.40
codegen_flags: <defaults>
</compile_context>

<pallas_src>
import functools

import jax
import jax.numpy as jnp
import numpy as np
from jax import lax
from jax.experimental import pallas as pl
from jax.experimental.pallas import tpu as pltpu


# ---------------------------------------------------------------------------
# Kernels
# ---------------------------------------------------------------------------
def _linear_kernel_accum_out(x_ref, w_ref, b_ref, o_ref):
    """f32-output path: accumulate directly into the resident output block.

    x_ref: (tm, tk) compute_dtype
    w_ref: (tn, tk) compute_dtype   -- PyTorch (N, K) layout, contract last dims
    b_ref: (1, tn)  f32
    o_ref: (tm, tn) f32             -- resident across the K grid axis
    """
    k = pl.program_id(2)

    @pl.when(k == 0)
    def _init():
        # Bias is added exactly once, folded into the accumulator init.
        o_ref[...] = jnp.broadcast_to(b_ref[...], o_ref.shape)

    o_ref[...] += lax.dot_general(
        x_ref[...], w_ref[...],
        dimension_numbers=(((1,), (1,)), ((), ())),
        preferred_element_type=jnp.float32,
    )


def _linear_kernel_scratch_acc(x_ref, w_ref, b_ref, o_ref, acc_ref):
    """Non-f32 output path: f32 VMEM accumulator, single lane-dense writeback."""
    k = pl.program_id(2)

    @pl.when(k == 0)
    def _init():
        acc_ref[...] = jnp.zeros_like(acc_ref)

    acc_ref[...] += lax.dot_general(
        x_ref[...], w_ref[...],
        dimension_numbers=(((1,), (1,)), ((), ())),
        preferred_element_type=jnp.float32,
    )

    @pl.when(k == pl.num_programs(2) - 1)
    def _writeback():
        o_ref[...] = (acc_ref[...] + b_ref[...]).astype(o_ref.dtype)


# ---------------------------------------------------------------------------
# Wrapper
# ---------------------------------------------------------------------------
def _round_up(v, m):
    return ((v + m - 1) // m) * m


def _pad2d(a, rows, cols):
    r, c = a.shape
    if r == rows and c == cols:
        return a
    return jnp.pad(a, ((0, rows - r), (0, cols - c)))


@functools.lru_cache(maxsize=1)
def _detect_tpu_generation():
    try:
        kind = jax.devices()[0].device_kind.lower()
    except Exception:  # pragma: no cover - defensive
        return "unknown"
    if "v7" in kind:
        return "v7x"
    if "v6" in kind:
        return "v6e"
    if "v5" in kind and ("lite" in kind or "v5e" in kind):
        return "v5e"
    return "unknown"


# (tm_target, tn_target, tk_target, vmem_cap_bytes) per generation.
_TILE_CONFIG = {
    # v5e: ~240 FLOP/byte crossover -> 512-class tiles already compute-bound.
    "v5e": (512, 512, 512, 96 * 1024 * 1024),
    # v6e: needs big output tiles to climb the HBM roofline; 128 MiB VMEM.
    "v6e": (1024, 1024, 512, 96 * 1024 * 1024),
    # v7x: only 64 MiB VMEM per TC -> cap the working set; 1024x1024x512
    # already exceeds the ~311 FLOP/byte crossover.
    "v7x": (1024, 1024, 512, 48 * 1024 * 1024),
    "unknown": (512, 512, 512, 64 * 1024 * 1024),
}


@functools.partial(
    jax.jit,
    static_argnames=("tm", "tn", "tk", "compute_dtype", "out_dtype", "vmem_limit"),
)
def _linear_forward_impl(x, weight, bias, *, tm, tn, tk, compute_dtype,
                         out_dtype, vmem_limit):
    M, K = x.shape
    N, _ = weight.shape

    Mp = pl.cdiv(M, tm) * tm
    Np = pl.cdiv(N, tn) * tn
    Kp = pl.cdiv(K, tk) * tk

    # Pad to tile multiples and cast matmul operands to the compute dtype.
    # The weight keeps its (N, K) layout -- no transpose pass over HBM; the
    # kernel contracts the last dim of both operands on the MXU.
    x_p = _pad2d(x, Mp, Kp).astype(compute_dtype)
    w_p = _pad2d(weight, Np, Kp).astype(compute_dtype)
    b_p = _pad2d(bias.astype(jnp.float32).reshape(1, N), 1, Np)

    grid = (Mp // tm, Np // tn, Kp // tk)
    m_blocks, n_blocks, _ = grid

    c_item = np.dtype(compute_dtype).itemsize
    o_item = np.dtype(out_dtype).itemsize
    # Under the (M, N, K) grid order, x is re-streamed once per N block column
    # and w once per M block row.
    bytes_accessed = int(
        n_blocks * Mp * Kp * c_item     # x re-streamed Np//tn times
        + m_blocks * Np * Kp * c_item   # w re-streamed Mp//tm times
        + m_blocks * Np * 4             # bias
        + Mp * Np * o_item              # output writeback
    )
    cost = pl.CostEstimate(
        flops=2 * Mp * Np * Kp,
        transcendentals=0,
        bytes_accessed=bytes_accessed,
    )

    if np.dtype(out_dtype) == np.dtype(jnp.float32):
        kernel = _linear_kernel_accum_out
        scratch_shapes = []
    else:
        kernel = _linear_kernel_scratch_acc
        scratch_shapes = [pltpu.VMEM((tm, tn), jnp.float32)]

    out_p = pl.pallas_call(
        kernel,
        out_shape=jax.ShapeDtypeStruct((Mp, Np), out_dtype),
        grid_spec=pltpu.PrefetchScalarGridSpec(
            num_scalar_prefetch=0,
            grid=grid,
            in_specs=[
                pl.BlockSpec((tm, tk), lambda i, j, k: (i, k)),   # x tile
                pl.BlockSpec((tn, tk), lambda i, j, k: (j, k)),   # w tile (N, K)
                pl.BlockSpec((1, tn), lambda i, j, k: (0, j)),    # bias tile
            ],
            out_specs=pl.BlockSpec((tm, tn), lambda i, j, k: (i, j)),
            scratch_shapes=scratch_shapes,
        ),
        compiler_params=pltpu.CompilerParams(
            dimension_semantics=("parallel", "parallel", "arbitrary"),
            vmem_limit_bytes=vmem_limit,
        ),
        cost_estimate=cost,
    )(x_p, w_p, b_p)

    return out_p[:M, :N]


def wrapped_model_forward(x, weight, bias, *, compute_dtype=jnp.bfloat16,
                          out_dtype=None, tiles=None):
    """Pallas equivalent of WrappedModel(nn.Linear(K, N)).forward(x).

    x      : (M, K)
    weight : (N, K)  (PyTorch nn.Linear weight layout -- NOT transposed here)
    bias   : (N,)

    Note: compute_dtype=bf16 gives full-rate MXU and half the HBM traffic but
    differs from a true f32 Linear by ~1e-2 relative error growing with
    sqrt(K); pass compute_dtype=jnp.float32 for bit-closer results at half
    the MXU rate.
    """
    M, K = x.shape
    N, Kw = weight.shape
    assert K == Kw and bias.shape == (N,)
    out_dtype = np.dtype(x.dtype if out_dtype is None else out_dtype)
    compute_dtype = np.dtype(compute_dtype)

    gen = _detect_tpu_generation()
    tm_t, tn_t, tk_t, vmem_cap = _TILE_CONFIG[gen]
    if tiles is not None:
        tm_t, tn_t, tk_t = tiles

    # Clamp tiles to the (padded) problem size.  Skinny activations
    # (M <= tile target) get tm = padded M -> single M block -> the weight is
    # streamed from HBM exactly once.
    tm = min(tm_t, _round_up(M, 8))
    tn = min(tn_t, _round_up(N, 128))
    tk = min(tk_t, _round_up(K, 128))
    # TODO(synk): on v7x, when M collapses to one block, consider halving tn
    #             so Np//tn >= 2 and both TensorCores get work on the N axis.

    # Tile-aware VMEM budget (double-buffered streams + output [+ acc scratch]).
    c_item = compute_dtype.itemsize
    needed = (
        2 * tm * tk * c_item            # x stream (double-buffered)
        + 2 * tn * tk * c_item          # w stream (double-buffered)
        + 2 * tn * 4                    # bias
        + 2 * tm * tn * out_dtype.itemsize  # output (double-buffered)
        + (0 if out_dtype == np.dtype(jnp.float32) else tm * tn * 4)
    )
    vmem_limit = int(min(vmem_cap, max(32 * 1024 * 1024, int(needed * 1.5))))

    return _linear_forward_impl(
        x, weight, bias,
        tm=tm, tn=tn, tk=tk,
        compute_dtype=compute_dtype, out_dtype=out_dtype,
        vmem_limit=vmem_limit,
    )


if __name__ == "__main__":
    key = jax.random.PRNGKey(0)
    kx, kw, kb, kx2, kw2, kb2 = jax.random.split(key, 6)

    # --- Small demo shapes: seq=8, hidden=32  (WrappedModel(nn.Linear(32, 32))) ---
    M, K, N = 8, 32, 32
    x = jax.random.normal(kx, (M, K), dtype=jnp.float32)
    weight = jax.random.normal(kw, (N, K), dtype=jnp.float32) * 0.1   # (N, K)
    bias = jax.random.normal(kb, (N,), dtype=jnp.float32) * 0.1       # (N,)

    out = jax.block_until_ready(wrapped_model_forward(x, weight, bias))
    ref = x @ weight.T + bias
    assert out.shape == (M, N)
    assert jnp.allclose(out, ref, atol=2e-2, rtol=2e-2), float(
        jnp.max(jnp.abs(out - ref))
    )

    # --- Multi-tile path: exercises K-axis accumulation + bias-once init ---
    M2, K2, N2 = 256, 256, 384
    x2 = jax.random.normal(kx2, (M2, K2), dtype=jnp.float32)
    w2 = jax.random.normal(kw2, (N2, K2), dtype=jnp.float32) * 0.05
    b2 = jax.random.normal(kb2, (N2,), dtype=jnp.float32) * 0.05

    out2 = jax.block_until_ready(wrapped_model_forward(x2, w2, b2))
    ref2 = x2 @ w2.T + b2
    assert out2.shape == (M2, N2)
    assert jnp.allclose(out2, ref2, atol=5e-2, rtol=5e-2), float(
        jnp.max(jnp.abs(out2 - ref2))
    )

    # --- Non-f32 output path (scratch-accumulator kernel) ---
    out3 = jax.block_until_ready(
        wrapped_model_forward(x2, w2, b2, out_dtype=jnp.bfloat16)
    )
    assert out3.dtype == jnp.bfloat16
    assert jnp.allclose(out3.astype(jnp.float32), ref2, atol=2e-1, rtol=2e-1)

    print("KERNEL_OK")
</pallas_src>

<mosaic_0001>
module attributes {stable_mosaic.version = 11 : i64} {
  func.func @_linear_kernel_accum_out(%arg0: i32, %arg1: i32, %arg2: i32, %arg3: memref<8x128xbf16, #tpu.memory_space<vmem>>, %arg4: memref<128x128xbf16, #tpu.memory_space<vmem>>, %arg5: memref<1x128xf32, #tpu.memory_space<vmem>>, %arg6: memref<8x128xf32, #tpu.memory_space<vmem>>) attributes {dimension_semantics = [#tpu.dimension_semantics<parallel>, #tpu.dimension_semantics<parallel>, #tpu.dimension_semantics<arbitrary>], iteration_bounds = array<i64: 1, 1, 1>, scalar_prefetch = 0 : i64, scratch_operands = 0 : i64, tpu.core_type = #tpu.core_type<tc>, window_params = [{transform_indices = @transform_0, window_bounds = array<i64: 8, 128>}, {transform_indices = @transform_1, window_bounds = array<i64: 128, 128>}, {transform_indices = @transform_2, window_bounds = array<i64: 1, 128>}, {transform_indices = @transform_3, window_bounds = array<i64: 8, 128>}]} {
    %c0_i32 = arith.constant 0 : i32
    %0 = arith.cmpi eq, %arg2, %c0_i32 : i32
    %1 = arith.extui %0 : i1 to i32
    %c0_i32_0 = arith.constant 0 : i32
    %2 = arith.cmpi ne, %1, %c0_i32_0 : i32
    scf.if %2 {
      %c0_8 = arith.constant 0 : index
      %c0_9 = arith.constant 0 : index
      %9 = vector.load %arg5[%c0_8, %c0_9] : memref<1x128xf32, #tpu.memory_space<vmem>>, vector<1x128xf32>
      %10 = vector.shape_cast %9 : vector<1x128xf32> to vector<1x128xf32>
      %11 = vector.broadcast %10 : vector<1x128xf32> to vector<8x128xf32>
      %c0_10 = arith.constant 0 : index
      %c0_11 = arith.constant 0 : index
      %12 = vector.load %arg6[%c0_10, %c0_11] : memref<8x128xf32, #tpu.memory_space<vmem>>, vector<8x128xf32>
      tpu.vector_store %arg6[%c0_10, %c0_11], %11 {strides = array<i32>} : memref<8x128xf32, #tpu.memory_space<vmem>>, vector<8x128xf32>,
    } else {
    }
    %c0 = arith.constant 0 : index
    %c0_1 = arith.constant 0 : index
    %3 = vector.load %arg6[%c0, %c0_1] : memref<8x128xf32, #tpu.memory_space<vmem>>, vector<8x128xf32>
    %c0_2 = arith.constant 0 : index
    %c0_3 = arith.constant 0 : index
    %4 = vector.load %arg3[%c0_2, %c0_3] : memref<8x128xbf16, #tpu.memory_space<vmem>>, vector<8x128xbf16>
    %c0_4 = arith.constant 0 : index
    %c0_5 = arith.constant 0 : index
    %5 = vector.load %arg4[%c0_4, %c0_5] : memref<128x128xbf16, #tpu.memory_space<vmem>>, vector<128x128xbf16>
    %cst = arith.constant dense<0.000000e+00> : vector<8x128xf32>
    %6 = tpu.matmul %4, %5, %cst {dimension_numbers = #tpu.dot_dimension_numbers<[1], [1], [0], [0], [0, 0, 1, 0], [], []>} : vector<8x128xbf16>, vector<128x128xbf16>, vector<8x128xf32> -> vector<8x128xf32>
    %7 = arith.addf %3, %6 : vector<8x128xf32>
    %c0_6 = arith.constant 0 : index
    %c0_7 = arith.constant 0 : index
    %8 = vector.load %arg6[%c0_6, %c0_7] : memref<8x128xf32, #tpu.memory_space<vmem>>, vector<8x128xf32>
    tpu.vector_store %arg6[%c0_6, %c0_7], %7 {strides = array<i32>} : memref<8x128xf32, #tpu.memory_space<vmem>>, vector<8x128xf32>,
    return
  }
  func.func @transform_0(%arg0: i32, %arg1: i32, %arg2: i32) -> (i32, i32) {
    %c0_i32 = arith.constant 0 : i32
    return %arg0, %arg2 : i32, i32
  }
  func.func @transform_1(%arg0: i32, %arg1: i32, %arg2: i32) -> (i32, i32) {
    %c0_i32 = arith.constant 0 : i32
    return %arg1, %arg2 : i32, i32
  }
  func.func @transform_2(%arg0: i32, %arg1: i32, %arg2: i32) -> (i32, i32) {
    %c0_i32 = arith.constant 0 : i32
    %c0_i32_0 = arith.constant 0 : i32
    return %c0_i32, %arg1 : i32, i32
  }
  func.func @transform_3(%arg0: i32, %arg1: i32, %arg2: i32) -> (i32, i32) {
    %c0_i32 = arith.constant 0 : i32
    return %arg0, %arg1 : i32, i32
  }
}

</mosaic_0001>

<bundles_post_ra>
// kernel: _linear_forward_impl.1
= control target key start
LH: loop header
LB: loop body
LE: loop exit
PB: predicated region body
PF: predicated region fallthrough
CT: control target
= control target key end

     0   :  { %v223_v1 = vmov 0.0   ;;  %vm224_vm0 = vmmov 0   ;;  %s288_s0 = inlined_call_operand.vmem [shape: bf16[8,128], index: 0, kind: input, shape index: {}]   ;;  %s289_s1 = inlined_call_operand.vmem [shape: bf16[128,128], index: 1, kind: input, shape index: {}]   ;;  %s290_s2 = inlined_call_operand.vmem [shape: f32[1,128], index: 2, kind: input, shape index: {}]   ;;  %s291_s3 = inlined_call_operand.hbm [shape: f32[8,128], index: 3, kind: output, shape index: {}]  }
   0x1   :  { %v191_v0 = vld [vmem:[%s289_s1] sm:$0xff]   ;;  %168 = vmatprep.subr.bf16.mxu0 %v223_v1  ;;  %184 = vmatprep.mubr.msk.bf16.mxu0 %vm224_vm0, %v223_v1  ;;  %v192_v2 = vld [vmem:[%s289_s1 + $0x8] sm:$0xff]  }
   0x2   :  { %169 = vmatpush3.bf16.xpose.msra.mxu0 %v191_v0 }
   0x3   :  { %170 = vmatprep.subr.bf16.mxu0 %v223_v1 }
   0x4   :  { %8 = vsyncpa [#allocation3], 0  ;;  %v193_v3 = vld [vmem:[%s289_s1 + $0x10] sm:$0xff]   ;;  %v194_v4 = vld [vmem:[%s289_s1 + $0x18] sm:$0xff]   ;;  %s225_s5 = smov [#allocation2]  }
   0x5   :  { %v195_v5 = vld [vmem:[%s289_s1 + $0x20] sm:$0xff]   ;;  %v196_v6 = vld [vmem:[%s289_s1 + $0x28] sm:$0xff]   ;;  %v197_v7 = vld [vmem:[%s289_s1 + $0x30] sm:$0xff]   ;;  %s142_s6 = sshll.u32 %s225_s5, 4  ;;  %s143_s6 = int_to_ptr.vmem [resolvable:$true] %s142_s6 }
   0x6   :  { %v198_v8 = vld [vmem:[%s289_s1 + $0x38] sm:$0xff]   ;;  %v29_v9 = vld [vmem:[%s288_s0] sm:$0xf]  ;;  %s199_s1 = scalar_lea.vmem %s143_s6, 128  ;;  %p204_p1 = scmp.lt.s32.totalorder %s143_s6, %s143_s6 }
   0x7   :  { %v150_v10 = vld [vmem:[%s290_s2] ss:$0 sm:$0xff]  ;;  %p200_p0 = scmp.ne.s32.totalorder %s143_s6, %s199_s1  ;;  %p205_p2 = scmp.lt.s32.totalorder %s199_s1, %s199_s1 }
   0x9   :  { %p206_p3 = por %p205_p2, %p204_p1 }
   0xa   :  { %171 = vmatpush3.bf16.xpose.msra.mxu0 %v192_v2 }
   0xb   :  { %172 = vmatprep.subr.bf16.mxu0 %v223_v1  ;;  %p207_p4 = pnand %p206_p3, %p200_p0 }
  0x12   :  { %173 = vmatpush3.bf16.xpose.msra.mxu0 %v193_v3 }
  0x13   :  { %174 = vmatprep.subr.bf16.mxu0 %v223_v1 }
  0x1a   :  { %175 = vmatpush3.bf16.xpose.msra.mxu0 %v194_v4 }
  0x1b   :  { %176 = vmatprep.subr.bf16.mxu0 %v223_v1 }
  0x22   :  { %177 = vmatpush3.bf16.xpose.msra.mxu0 %v195_v5 }
  0x23   :  { %178 = vmatprep.subr.bf16.mxu0 %v223_v1 }
  0x2a   :  { %179 = vmatpush3.bf16.xpose.msra.mxu0 %v196_v6 }
  0x2b   :  { %180 = vmatprep.subr.bf16.mxu0 %v223_v1 }
  0x32   :  { %181 = vmatpush3.bf16.xpose.msra.mxu0 %v197_v7 }
  0x33   :  { %182 = vmatprep.subr.bf16.mxu0 %v223_v1 }
  0x3a   :  { %183 = vmatpush3.bf16.xpose.msra.mxu0 %v198_v8 }
  0x41   :  { %185 = vmatmul.mubr.bf16.vlgmr.msra.gmra.mrb[0].mxu0 %v29_v9 }
 0x114   :  { %v128_v11 = vpop.f32.mrb[0].mxu0 }
 0x115   :  { %v134_v12 = vadd.f32 %v150_v10, %v128_v11  ;;  %v186_v13 = vpop.f32.mrb[1].mxu0 }
 0x116   :  { %v131_v14 = vpop.f32.mrb[2].mxu0 }
 0x117   :  { %135 = vst [vmem:[#allocation2] sm:$0xff] %v134_v12  ;;  %v187_v15 = vpop.f32.mrb[3].mxu0 }
 0x118   :  { %210 = shalt.err (!%p207_p4)
}
 0x119   :  { %s211_s2 = scalar_lea.hbm %s291_s3, 128 }
 0x11a   :  { %p212_p5 = scmp.ne.s32.totalorder %s291_s3, %s211_s2  ;;  %p215_p6 = scmp.lt.u32.totalorder %s211_s2, %s291_s3 }
 0x11c   :  { %p217_p7 = pnand %p215_p6, %p212_p5 }
 0x11e   :  { %220 = shalt.err (!%p217_p7)
}
 0x11f   :  { %145 = dma.vmem_to_hbm [thread:$0]  %s143_s6, 128, %s291_s3, [#allocation3]  }
 0x120   :  { %221 = dma.done.wait [#allocation3], 128  }
 0x121   :  { %222 = vsyncadd [#allocation3], 4294967168 }
 0x122   :  { %149 = vsyncpa [#allocation3], 1 }

</bundles_post_ra>
